<compile_context>
chip_gen: v7x
topology: tpu7x:2x2x1
jax: 0.10.0
libtpu: 0.0.40
codegen_flags: <defaults>
</compile_context>

<pallas_src>
import functools

import jax
import jax.numpy as jnp
import numpy as np
from jax import lax
from jax.experimental import pallas as pl
from jax.experimental.pallas import tpu as pltpu


def _round_up(x, m):
    return ((x + m - 1) // m) * m


def _make_gather_kernel(token_block, apply_dropout):
    """DMA row-gather from an HBM embedding table + optional dropout scaling."""

    def body(ids_ref, emb_hbm, scale_ref, out_ref, gather_buf, sem):
        base = pl.program_id(0) * token_block

        # Issue one row DMA per token in this block (HBM -> VMEM gather buffer).
        def issue(t, carry):
            row = ids_ref[base + t]
            pltpu.make_async_copy(emb_hbm.at[row], gather_buf.at[t], sem).start()
            return carry

        lax.fori_loop(0, token_block, issue, 0)

        # Drain: each wait decrements the semaphore by one row's worth of bytes
        # (all rows are the same size, so token_block waits == all DMAs done).
        def drain(t, carry):
            pltpu.make_async_copy(emb_hbm.at[0], gather_buf.at[t], sem).wait()
            return carry

        lax.fori_loop(0, token_block, drain, 0)

        rows = gather_buf[...]
        if apply_dropout:
            rows = rows * scale_ref[...]
        out_ref[...] = rows.astype(out_ref.dtype)

    if apply_dropout:
        def kernel(ids_ref, emb_hbm, scale_ref, out_ref, gather_buf, sem):
            body(ids_ref, emb_hbm, scale_ref, out_ref, gather_buf, sem)
    else:
        def kernel(ids_ref, emb_hbm, out_ref, gather_buf, sem):
            body(ids_ref, emb_hbm, None, out_ref, gather_buf, sem)
    return kernel


@functools.partial(jax.jit, static_argnames=(
    "pad_idx", "unk_idx", "word_dropout", "dropout", "training", "token_block"))
def token_embedding_forward(words, emb_table, rng_key, *, pad_idx, unk_idx,
                            word_dropout=0.0, dropout=0.0, training=False,
                            token_block=128):
    """words: (B, T) int32; emb_table: (V, D) float32 -> (B, T, D) float32."""
    B, T = words.shape
    V, D = emb_table.shape
    N = B * T

    ids = words.reshape(N).astype(jnp.int32)
    # nn.Embedding raises on out-of-range ids; a Pallas DMA has no bounds check,
    # so clamp into [0, V) instead of reading out of bounds.
    ids = jnp.clip(ids, 0, V - 1)

    k_word, k_drop = jax.random.split(rng_key)

    # ---- drop_word(): replace non-pad tokens with unk w.p. word_dropout ----
    if training and word_dropout > 0.0:
        u = jax.random.uniform(k_word, (N,), dtype=jnp.float32)
        drop = (u < jnp.float32(word_dropout)) & (ids != jnp.int32(pad_idx))
        ids = jnp.where(drop, jnp.int32(unk_idx), ids)

    # ---- lane-dense / block-aligned padding ----
    D_pad = _round_up(D, 128)                       # lane-dense output tiles
    tb = max(8, _round_up(min(token_block, _round_up(N, 8)), 8))
    N_pad = _round_up(N, tb)                        # no N % token_block assert

    emb_padded = emb_table
    if D_pad != D:
        emb_padded = jnp.pad(emb_table, ((0, 0), (0, D_pad - D)))
    ids_padded = ids
    if N_pad != N:
        ids_padded = jnp.pad(ids, (0, N_pad - N))   # padded tokens gather row 0

    apply_dropout = bool(training and dropout > 0.0)
    kernel = _make_gather_kernel(tb, apply_dropout)

    in_specs = [pl.BlockSpec(memory_space=pl.ANY)]  # table stays in HBM
    operands = [emb_padded]
    if apply_dropout:
        keep = jax.random.uniform(k_drop, (N_pad, D_pad),
                                  dtype=jnp.float32) >= jnp.float32(dropout)
        scale = keep.astype(jnp.float32) * jnp.float32(1.0 / (1.0 - dropout))
        in_specs.append(pl.BlockSpec((tb, D_pad), lambda i, ids_r: (i, 0)))
        operands.append(scale)

    out_flat = pl.pallas_call(
        kernel,
        out_shape=jax.ShapeDtypeStruct((N_pad, D_pad), emb_table.dtype),
        grid_spec=pltpu.PrefetchScalarGridSpec(
            num_scalar_prefetch=1,                  # token ids -> SMEM
            grid=(N_pad // tb,),
            in_specs=in_specs,
            out_specs=pl.BlockSpec((tb, D_pad), lambda i, ids_r: (i, 0)),
            scratch_shapes=[
                pltpu.VMEM((tb, D_pad), emb_table.dtype),   # gathered rows
                pltpu.SemaphoreType.DMA(()),                # shared DMA semaphore
            ],
        ),
        compiler_params=pltpu.CompilerParams(
            dimension_semantics=("parallel",)),     # token axis is independent
    )(ids_padded, *operands)

    return out_flat[:N, :D].reshape(B, T, D)


if __name__ == "__main__":
    # Deterministic synthetic setup (no checkpoint loading).
    key = jax.random.PRNGKey(0)
    k_emb, k_words, k_fwd = jax.random.split(key, 3)

    V, D = 128, 32          # vocab size, embed size
    B, T = 2, 8             # batch, seq len
    PAD_IDX, UNK_IDX = 0, 1
    WORD_DROPOUT, DROPOUT = 0.3, 0.5

    emb_table = jax.random.normal(k_emb, (V, D), dtype=jnp.float32)
    words = jax.random.randint(k_words, (B, T), 0, V, dtype=jnp.int32)
    # make sure some padding tokens are present
    words = words.at[0, 0].set(PAD_IDX).at[1, 3].set(PAD_IDX)

    # Eval path (word_dropout / dropout inactive) -> verify against pure-JAX ref.
    out_eval = token_embedding_forward(
        words, emb_table, k_fwd, pad_idx=PAD_IDX, unk_idx=UNK_IDX,
        word_dropout=WORD_DROPOUT, dropout=DROPOUT, training=False)
    out_eval = jax.block_until_ready(out_eval)
    ref = jnp.take(emb_table, words, axis=0)
    np.testing.assert_allclose(np.asarray(out_eval), np.asarray(ref),
                               rtol=1e-6, atol=1e-6)

    # Training path (exercises word dropout + dropout scaling inside the kernel).
    out_train = token_embedding_forward(
        words, emb_table, k_fwd, pad_idx=PAD_IDX, unk_idx=UNK_IDX,
        word_dropout=WORD_DROPOUT, dropout=DROPOUT, training=True)
    out_train = jax.block_until_ready(out_train)
    assert out_train.shape == (B, T, D)
    assert bool(jnp.isfinite(out_train).all())

    print("KERNEL_OK")
</pallas_src>

<mosaic_0001>
module attributes {stable_mosaic.version = 11 : i64} {
  func.func @kernel(%arg0: i32, %arg1: memref<16xi32, #tpu.memory_space<smem>>, %arg2: memref<128x128xf32, #tpu.memory_space<any>>, %arg3: memref<16x128xf32, #tpu.memory_space<vmem>>, %arg4: memref<16x128xf32, #tpu.memory_space<vmem>>, %arg5: memref<!tpu.dma_semaphore, #tpu.memory_space<semaphore_mem>>) attributes {dimension_semantics = [#tpu.dimension_semantics<parallel>], iteration_bounds = array<i64: 1>, scalar_prefetch = 1 : i64, scratch_operands = 2 : i64, tpu.core_type = #tpu.core_type<tc>, window_params = [{}, {transform_indices = @transform_1, window_bounds = array<i64: 16, 128>}]} {
    %c16_i32 = arith.constant 16 : i32
    %0 = arith.muli %arg0, %c16_i32 : i32
    %c0_i32 = arith.constant 0 : i32
    %c16_i32_0 = arith.constant 16 : i32
    %1 = arith.addi %c0_i32, %c16_i32_0 : i32
    %c1_i32 = arith.constant 1 : i32
    scf.for %arg6 = %c0_i32 to %1 step %c1_i32  : i32 {
      %5 = arith.addi %0, %arg6 : i32
      %6 = arith.index_cast %5 : i32 to index
      %7 = memref.load %arg1[%6] : memref<16xi32, #tpu.memory_space<smem>>
      %c0_i32_9 = arith.constant 0 : i32
      %8 = tpu.memref_slice %arg2[%7, %c0_i32_9] : memref<128x128xf32, #tpu.memory_space<any>> -> memref<1x128xf32, #tpu.memory_space<any>>
      %9 = tpu.memref_squeeze %8 : memref<1x128xf32, #tpu.memory_space<any>> -> memref<128xf32, #tpu.memory_space<any>>
      %c0_i32_10 = arith.constant 0 : i32
      %10 = tpu.memref_slice %arg4[%arg6, %c0_i32_10] : memref<16x128xf32, #tpu.memory_space<vmem>> -> memref<1x128xf32, #tpu.memory_space<vmem>>
      %11 = tpu.memref_squeeze %10 : memref<1x128xf32, #tpu.memory_space<vmem>> -> memref<128xf32, #tpu.memory_space<vmem>>
      tpu.enqueue_dma source(%9 : memref<128xf32, #tpu.memory_space<any>>) target(%11 : memref<128xf32, #tpu.memory_space<vmem>>) target_semaphore(%arg5 : memref<!tpu.dma_semaphore, #tpu.memory_space<semaphore_mem>>)
    }
    %c16_i32_1 = arith.constant 16 : i32
    %c0_i32_2 = arith.constant 0 : i32
    %c16_i32_3 = arith.constant 16 : i32
    %2 = arith.addi %c0_i32_2, %c16_i32_3 : i32
    %c1_i32_4 = arith.constant 1 : i32
    scf.for %arg6 = %c0_i32_2 to %2 step %c1_i32_4  : i32 {
      %c0_i32_9 = arith.constant 0 : i32
      %c0_i32_10 = arith.constant 0 : i32
      %5 = tpu.memref_slice %arg2[%c0_i32_9, %c0_i32_10] : memref<128x128xf32, #tpu.memory_space<any>> -> memref<1x128xf32, #tpu.memory_space<any>>
      %6 = tpu.memref_squeeze %5 : memref<1x128xf32, #tpu.memory_space<any>> -> memref<128xf32, #tpu.memory_space<any>>
      %c0_i32_11 = arith.constant 0 : i32
      %7 = tpu.memref_slice %arg4[%arg6, %c0_i32_11] : memref<16x128xf32, #tpu.memory_space<vmem>> -> memref<1x128xf32, #tpu.memory_space<vmem>>
      %8 = tpu.memref_squeeze %7 : memref<1x128xf32, #tpu.memory_space<vmem>> -> memref<128xf32, #tpu.memory_space<vmem>>
      tpu.wait_dma2 semaphore(%arg5 : memref<!tpu.dma_semaphore, #tpu.memory_space<semaphore_mem>>) src(%6 : memref<128xf32, #tpu.memory_space<any>>) dst(%8 : memref<128xf32, #tpu.memory_space<vmem>>)
    }
    %c16_i32_5 = arith.constant 16 : i32
    %c0 = arith.constant 0 : index
    %c0_6 = arith.constant 0 : index
    %3 = vector.load %arg4[%c0, %c0_6] : memref<16x128xf32, #tpu.memory_space<vmem>>, vector<16x128xf32>
    %c0_7 = arith.constant 0 : index
    %c0_8 = arith.constant 0 : index
    %4 = vector.load %arg3[%c0_7, %c0_8] : memref<16x128xf32, #tpu.memory_space<vmem>>, vector<16x128xf32>
    tpu.vector_store %arg3[%c0_7, %c0_8], %3 {strides = array<i32>} : memref<16x128xf32, #tpu.memory_space<vmem>>, vector<16x128xf32>,
    return
  }
  func.func @transform_1(%arg0: i32, %arg1: memref<16xi32, #tpu.memory_space<smem>>) -> (i32, i32) {
    %c0_i32 = arith.constant 0 : i32
    %c0_i32_0 = arith.constant 0 : i32
    return %arg0, %c0_i32 : i32, i32
  }
}

</mosaic_0001>

<bundles_post_ra>
// kernel: token_embedding_forward.1
= control target key start
LH: loop header
LB: loop body
LE: loop exit
PB: predicated region body
PF: predicated region fallthrough
CT: control target
= control target key end

     0   :  { %s190_s0 = inlined_call_operand.vmem [shape: s32[16], index: 0, kind: input, shape index: {}]   ;;  %s191_s1 = inlined_call_operand.vmem [shape: f32[128,128], index: 1, kind: input, shape index: {}]   ;;  %s192_s2 = inlined_call_operand.vmem [shape: f32[16,128], index: 2, kind: output, shape index: {}]  }
   0x1   :  { %s7_s11 = sshll.u32 %s190_s0, 4  ;;  %s8_s11 = int_to_ptr.vmem [resolvable:$true] %s7_s11 }
   0x2   :  { %s130_s12 = scalar_lea.vmem %s8_s11, 16  ;;  %p135_p1 = scmp.lt.s32.totalorder %s8_s11, %s8_s11 }
   0x3   :  { %p131_p0 = scmp.ne.s32.totalorder %s8_s11, %s130_s12  ;;  %p136_p2 = scmp.lt.s32.totalorder %s130_s12, %s130_s12 }
   0x5   :  { %p137_p3 = por %p136_p2, %p135_p1 }
   0x7   :  { %p138_p4 = pnand %p137_p3, %p131_p0 }
   0x9   :  { %141 = shalt.err (!%p138_p4)  }
   0xa   :  { %s162_s13 = smov [#allocation5]  }
   0xb   :  { %10 = dma.vmem_to_smem %s8_s11, 16, %s162_s13, [#allocation4] }
   0xc   :  { %150 = dma.done.wait [#allocation4], 16 }
   0xd   :  { %151 = vsyncadd [#allocation4], 4294967280 }
   0xe   :  { %12 = sfence }
   0xf   :  { %s154_s14 = smov 0  }
  0x10 LB: > { %s21_s15 = sld [smem:[#allocation5 + %s156_s14]]  ;;  %s23_s18 = scalar_lea.vmem [#allocation2], %s156_s14  ;;  %s156_s14 = sphi %s154_s14, %s19_s14  }
  0x16   : > { %s22_s17 = scalar_lea.vmem %s191_s1, %s21_s15 }
  0x17   : > { %v41_v0 = vld [vmem:[%s22_s17] sm:$0x1] }
  0x18   : > { %42 = vst [vmem:[%s23_s18] sm:$0x1] %v41_v0 }
  0x19   : > { %67 = vsyncadd [#allocation3], 16  ;;  %s19_s14 = sadd.s32 1, %s156_s14  }
  0x1a   : > { %p16_p5 = scmp.ge.s32.totalorder %s19_s14, 16  }
  0x1b   :  { %s158_s19 = smov (%p16_p5), 0  }
  0x1c   :  { %18 = sbr.rel (!%p16_p5) target bundleno = 16 (0x10), region = 76 }
  0x23 LB: > { %152 = dma.done.wait [#allocation3], 16  ;;  %s160_s19 = sphi %s158_s19, %s73_s19  }
  0x24   : > { %153 = vsyncadd [#allocation3], 4294967280  ;;  %s73_s19 = sadd.s32 1, %s160_s19  }
  0x25   : > { %p70_p6 = scmp.ge.s32.totalorder %s73_s19, 16  }
  0x26   :  { %v76_v1 = vld [vmem:[#allocation2] sm:$0xff] (%p70_p6)  ;;  %v77_v2 = vld [vmem:[#allocation2 + $0x8] sm:$0xff] (%p70_p6) }
  0x27   :  { %72 = sbr.rel (!%p70_p6) target bundleno = 35 (0x23), region = 87  ;;  %78 = vst [vmem:[%s192_s2] sm:$0xff] (%p70_p6), %v76_v1  ;;  %79 = vst [vmem:[%s192_s2 + $0x8] sm:$0xff] (%p70_p6), %v77_v2 }
  0x2e   :  { %84 = vsyncmov [#allocation3] }
  0x31   :  { %s85_s1 = vpop.sfrf %84 }
  0x32   :  { %p112_p7 = scmp.ne.s32.totalorder %s85_s1, 0 }
  0x34   :  { %89 = shalt.err (%p112_p7)  }

</bundles_post_ra>
